<compile_context>
chip_gen: v6e
topology: v6e:2x2x1
jax: 0.10.0
libtpu: 0.0.40
codegen_flags: <defaults>
</compile_context>

<pallas_src>
import jax
import jax.numpy as jnp
from jax.experimental import pallas as pl
from jax.experimental.pallas import tpu as pltpu

STATE_SIZE = 24          # Reacher/Tennis-style dims
ACTION_SIZE = 2
FC_UNITS = [256, 256, 128]


def _round_up(x, m):
    return ((x + m - 1) // m) * m


def _resident_spec(arr):
    """Grid-invariant operand: full block, constant index_map, single-buffered."""
    idx = lambda i: (0,) * arr.ndim
    try:
        return pl.BlockSpec(arr.shape, idx, pipeline_mode=pl.Buffered(1))
    except TypeError:   # older jax without pipeline_mode kwarg
        return pl.BlockSpec(arr.shape, idx)


def critic_kernel(state_ref, action_ref, w1s_ref, w1a_ref, b1_ref,
                  w2_ref, b2_ref, w3_ref, b3_ref, w4t_ref, b4_ref, out_ref):
    # fc1 (split-K over the [state | action] concat): relu(s@W1s + a@W1a + b1)
    s = state_ref[...].astype(jnp.bfloat16)
    a = action_ref[...].astype(jnp.bfloat16)
    h = (jnp.dot(s, w1s_ref[...], preferred_element_type=jnp.float32)
         + jnp.dot(a, w1a_ref[...], preferred_element_type=jnp.float32)
         + b1_ref[...])
    h = jnp.maximum(h, 0.0).astype(jnp.bfloat16)
    # fc2: relu
    h = jnp.dot(h, w2_ref[...], preferred_element_type=jnp.float32) + b2_ref[...]
    h = jnp.maximum(h, 0.0).astype(jnp.bfloat16)
    # fc3: relu (kept f32 into the Q head for precision; cost is negligible)
    h = jnp.dot(h, w3_ref[...], preferred_element_type=jnp.float32) + b3_ref[...]
    h = jnp.maximum(h, 0.0)
    # fc4 (Q head, 128 -> 1): contract w4^T (1, 128) against the feature axis
    # of h (bm, 128) -> (1, bm): a lane-dense output block.
    q = jax.lax.dot_general(
        w4t_ref[...], h,
        dimension_numbers=(((1,), (1,)), ((), ())),
        preferred_element_type=jnp.float32)
    out_ref[...] = (q + b4_ref[0, 0]).astype(out_ref.dtype)


def critic_ddpg_forward(state, action, params, *, bm=1024):
    """Q(s, a) via a single fused Pallas kernel, tiled over the batch dim."""
    assert bm % 128 == 0, "bm must be a multiple of 128"
    w1, b1, w2, b2, w3, b3, w4, b4 = params
    B = state.shape[0]
    s_dim = state.shape[1]
    a_dim = action.shape[1]
    h1, h2, h3 = w1.shape[1], w2.shape[1], w3.shape[1]

    # Batch tile: as large as possible (amortize per-step overhead), but
    #   * never larger than the 128-rounded batch (tiny-batch case),
    #   * at least 2 grid steps when the batch covers >= 256 rows so the
    #     "parallel" axis can shard across both TensorCores on v7x.
    b128 = _round_up(max(B, 1), 128)
    bm_eff = min(bm, b128)
    if b128 >= 2 * 128:
        bm_eff = min(bm_eff, _round_up((b128 + 1) // 2, 128))
    n_tiles = pl.cdiv(B, bm_eff)

    # Grid-invariant parameters: bf16 weights (f32 accumulation in-kernel),
    # f32 biases, Q-head weight kept f32 (tiny), Q-head bias as SMEM scalar.
    # fc1 weight is split along K so no concat/pad of the inputs is needed.
    w1s = w1[:s_dim].astype(jnp.bfloat16)           # (s_dim, h1)
    w1a = w1[s_dim:s_dim + a_dim].astype(jnp.bfloat16)  # (a_dim, h1)
    w2b = w2.astype(jnp.bfloat16)
    w3b = w3.astype(jnp.bfloat16)
    w4t = w4.T.astype(jnp.float32)                   # (1, h3)
    b1f = b1.astype(jnp.float32).reshape(1, h1)
    b2f = b2.astype(jnp.float32).reshape(1, h2)
    b3f = b3.astype(jnp.float32).reshape(1, h3)
    b4f = b4.astype(jnp.float32).reshape(1, 1)

    flops = 2 * n_tiles * bm_eff * (s_dim * h1 + a_dim * h1
                                    + h1 * h2 + h2 * h3 + h3)
    bytes_accessed = (
        (state.size + action.size) * state.dtype.itemsize
        + (w1s.size + w1a.size + w2b.size + w3b.size) * 2
        + (w4t.size + b1f.size + b2f.size + b3f.size + b4f.size) * 4
        + n_tiles * bm_eff * 4)

    out = pl.pallas_call(
        critic_kernel,
        out_shape=jax.ShapeDtypeStruct((1, n_tiles * bm_eff), jnp.float32),
        grid=(n_tiles,),
        in_specs=[
            pl.BlockSpec((bm_eff, s_dim), lambda i: (i, 0)),
            pl.BlockSpec((bm_eff, a_dim), lambda i: (i, 0)),
            _resident_spec(w1s), _resident_spec(w1a), _resident_spec(b1f),
            _resident_spec(w2b), _resident_spec(b2f),
            _resident_spec(w3b), _resident_spec(b3f),
            _resident_spec(w4t),
            pl.BlockSpec(memory_space=pltpu.MemorySpace.SMEM),   # b4 scalar
        ],
        out_specs=pl.BlockSpec((1, bm_eff), lambda i: (0, i)),
        compiler_params=pltpu.CompilerParams(
            dimension_semantics=("parallel",)),
        cost_estimate=pl.CostEstimate(
            flops=int(flops),
            bytes_accessed=int(bytes_accessed),
            transcendentals=0),
    )(state, action, w1s, w1a, b1f, w2b, b2f, w3b, b3f, w4t, b4f)

    # Lane-dense (1, n_tiles*bm) layout; columns are batch rows in order.
    # Padded/partial-tile columns (undefined data) are sliced off here.
    return out[0, :B].reshape(B, 1)


def init_params(key, state_size=STATE_SIZE, action_size=ACTION_SIZE,
                fc_units=FC_UNITS):
    """f32 params mirroring Critic_DDPG.reset_parameters semantics.

    Weights stored as [in_features, out_features] (transpose of nn.Linear),
    biases as [1, out_features].
      - hidden layers: uniform(-lim, lim) with lim = 1/sqrt(weight.size(0))
        (the original's fan-in quirk uses out_features; reproduced here)
      - final layer: orthogonal (unit-norm row, since out=1) scaled by 1e-3,
        bias = 0.
    """
    dims_in = [state_size + action_size] + list(fc_units)   # [26, 256, 256, 128]
    dims_out = list(fc_units) + [1]                          # [256, 256, 128, 1]
    ks = jax.random.split(key, 2 * len(dims_in))

    params = []
    for i, (din, dout) in enumerate(zip(dims_in, dims_out)):
        if i < len(dims_in) - 1:
            lim = 1.0 / jnp.sqrt(jnp.float32(dout))
            w = jax.random.uniform(ks[2 * i], (din, dout), jnp.float32, -lim, lim)
            blim = 1.0 / jnp.sqrt(jnp.float32(din))
            b = jax.random.uniform(ks[2 * i + 1], (1, dout), jnp.float32,
                                   -blim, blim)
        else:
            w = jax.random.normal(ks[2 * i], (din, dout), jnp.float32)
            w = w / jnp.linalg.norm(w) * 0.001
            b = jnp.zeros((1, dout), jnp.float32)
        params.extend([w, b])
    return tuple(params)   # (w1, b1, w2, b2, w3, b3, w4, b4)


def reference_forward_f32(state, action, params):
    w1, b1, w2, b2, w3, b3, w4, b4 = params
    x = jnp.concatenate([state, action], axis=1)
    h = jax.nn.relu(x @ w1 + b1)
    h = jax.nn.relu(h @ w2 + b2)
    h = jax.nn.relu(h @ w3 + b3)
    return h @ w4 + b4


def reference_forward_kernel_numerics(state, action, params):
    """Mimics the kernel numerics: bf16 operands, f32 accumulation, f32 head."""
    w1, b1, w2, b2, w3, b3, w4, b4 = params
    s_dim = state.shape[1]
    bf = lambda a: a.astype(jnp.bfloat16)
    h = (jnp.dot(bf(state), bf(w1[:s_dim]), preferred_element_type=jnp.float32)
         + jnp.dot(bf(action), bf(w1[s_dim:]), preferred_element_type=jnp.float32)
         + b1)
    h = jnp.maximum(h, 0.0)
    h = jnp.dot(bf(h), bf(w2), preferred_element_type=jnp.float32) + b2
    h = jnp.maximum(h, 0.0)
    h = jnp.dot(bf(h), bf(w3), preferred_element_type=jnp.float32) + b3
    h = jnp.maximum(h, 0.0)
    return jnp.dot(h, w4.astype(jnp.float32),
                   preferred_element_type=jnp.float32) + b4


if __name__ == "__main__":
    key = jax.random.PRNGKey(0)
    k_param, k_data = jax.random.split(key)
    params = init_params(k_param)

    # batch=4: single partial tile; batch=300: two tiles (partial last tile),
    # exercises the >=2-tile megacore path.
    for batch in (4, 300):
        ks, ka = jax.random.split(jax.random.fold_in(k_data, batch))
        state = jax.random.normal(ks, (batch, STATE_SIZE), jnp.float32)
        action = jax.random.normal(ka, (batch, ACTION_SIZE), jnp.float32)

        q = jax.block_until_ready(critic_ddpg_forward(state, action, params))
        assert q.shape == (batch, 1)

        q_kn = reference_forward_kernel_numerics(state, action, params)
        q_f32 = reference_forward_f32(state, action, params)
        assert jnp.allclose(q, q_kn, rtol=2e-3, atol=1e-5), \
            "mismatch vs kernel-numerics JAX reference"
        assert jnp.allclose(q, q_f32, rtol=5e-2, atol=5e-4), \
            "mismatch vs f32 JAX reference (beyond expected bf16 loss)"

    print("KERNEL_OK")
</pallas_src>

<mosaic_0001>
module attributes {stable_mosaic.version = 11 : i64} {
  func.func @critic_kernel(%arg0: i32, %arg1: memref<128x24xf32, #tpu.memory_space<vmem>>, %arg2: memref<128x2xf32, #tpu.memory_space<vmem>>, %arg3: memref<24x256xbf16, #tpu.memory_space<vmem>>, %arg4: memref<2x256xbf16, #tpu.memory_space<vmem>>, %arg5: memref<1x256xf32, #tpu.memory_space<vmem>>, %arg6: memref<256x256xbf16, #tpu.memory_space<vmem>>, %arg7: memref<1x256xf32, #tpu.memory_space<vmem>>, %arg8: memref<256x128xbf16, #tpu.memory_space<vmem>>, %arg9: memref<1x128xf32, #tpu.memory_space<vmem>>, %arg10: memref<1x128xf32, #tpu.memory_space<vmem>>, %arg11: memref<1x1xf32, #tpu.memory_space<smem>>, %arg12: memref<1x128xf32, #tpu.memory_space<vmem>>) attributes {dimension_semantics = [#tpu.dimension_semantics<parallel>], iteration_bounds = array<i64: 1>, scalar_prefetch = 0 : i64, scratch_operands = 0 : i64, tpu.core_type = #tpu.core_type<tc>, window_params = [{transform_indices = @transform_0, window_bounds = array<i64: 128, 24>}, {transform_indices = @transform_1, window_bounds = array<i64: 128, 2>}, {pipeline_mode = #tpu.pipeline_mode<synchronous>, transform_indices = @transform_2, window_bounds = array<i64: 24, 256>}, {pipeline_mode = #tpu.pipeline_mode<synchronous>, transform_indices = @transform_3, window_bounds = array<i64: 2, 256>}, {pipeline_mode = #tpu.pipeline_mode<synchronous>, transform_indices = @transform_4, window_bounds = array<i64: 1, 256>}, {pipeline_mode = #tpu.pipeline_mode<synchronous>, transform_indices = @transform_5, window_bounds = array<i64: 256, 256>}, {pipeline_mode = #tpu.pipeline_mode<synchronous>, transform_indices = @transform_6, window_bounds = array<i64: 1, 256>}, {pipeline_mode = #tpu.pipeline_mode<synchronous>, transform_indices = @transform_7, window_bounds = array<i64: 256, 128>}, {pipeline_mode = #tpu.pipeline_mode<synchronous>, transform_indices = @transform_8, window_bounds = array<i64: 1, 128>}, {pipeline_mode = #tpu.pipeline_mode<synchronous>, transform_indices = @transform_9, window_bounds = array<i64: 1, 128>}, {transform_indices = @transform_10, window_bounds = array<i64: 1, 1>}, {transform_indices = @transform_11, window_bounds = array<i64: 1, 128>}]} {
    %c0 = arith.constant 0 : index
    %c0_0 = arith.constant 0 : index
    %0 = vector.load %arg1[%c0, %c0_0] : memref<128x24xf32, #tpu.memory_space<vmem>>, vector<128x24xf32>
    %1 = arith.truncf %0 : vector<128x24xf32> to vector<128x24xbf16>
    %c0_1 = arith.constant 0 : index
    %c0_2 = arith.constant 0 : index
    %2 = vector.load %arg2[%c0_1, %c0_2] : memref<128x2xf32, #tpu.memory_space<vmem>>, vector<128x2xf32>
    %3 = arith.truncf %2 : vector<128x2xf32> to vector<128x2xbf16>
    %c0_3 = arith.constant 0 : index
    %c0_4 = arith.constant 0 : index
    %4 = vector.load %arg3[%c0_3, %c0_4] : memref<24x256xbf16, #tpu.memory_space<vmem>>, vector<24x256xbf16>
    %cst = arith.constant dense<0.000000e+00> : vector<128x256xf32>
    %5 = tpu.matmul %1, %4, %cst {dimension_numbers = #tpu.dot_dimension_numbers<[1], [0], [0], [1], [0, 0, 1, 1], [], []>} : vector<128x24xbf16>, vector<24x256xbf16>, vector<128x256xf32> -> vector<128x256xf32>
    %c0_5 = arith.constant 0 : index
    %c0_6 = arith.constant 0 : index
    %6 = vector.load %arg4[%c0_5, %c0_6] : memref<2x256xbf16, #tpu.memory_space<vmem>>, vector<2x256xbf16>
    %cst_7 = arith.constant dense<0.000000e+00> : vector<128x256xf32>
    %7 = tpu.matmul %3, %6, %cst_7 {dimension_numbers = #tpu.dot_dimension_numbers<[1], [0], [0], [1], [0, 0, 1, 1], [], []>} : vector<128x2xbf16>, vector<2x256xbf16>, vector<128x256xf32> -> vector<128x256xf32>
    %8 = arith.addf %5, %7 : vector<128x256xf32>
    %c0_8 = arith.constant 0 : index
    %c0_9 = arith.constant 0 : index
    %9 = vector.load %arg5[%c0_8, %c0_9] : memref<1x256xf32, #tpu.memory_space<vmem>>, vector<1x256xf32>
    %10 = vector.broadcast %9 : vector<1x256xf32> to vector<128x256xf32>
    %11 = arith.addf %8, %10 : vector<128x256xf32>
    %cst_10 = arith.constant 0.000000e+00 : f32
    %12 = vector.broadcast %cst_10 : f32 to vector<128x256xf32>
    %13 = arith.maximumf %11, %12 : vector<128x256xf32>
    %14 = arith.truncf %13 : vector<128x256xf32> to vector<128x256xbf16>
    %c0_11 = arith.constant 0 : index
    %c0_12 = arith.constant 0 : index
    %15 = vector.load %arg6[%c0_11, %c0_12] : memref<256x256xbf16, #tpu.memory_space<vmem>>, vector<256x256xbf16>
    %cst_13 = arith.constant dense<0.000000e+00> : vector<128x256xf32>
    %16 = tpu.matmul %14, %15, %cst_13 {dimension_numbers = #tpu.dot_dimension_numbers<[1], [0], [0], [1], [0, 0, 1, 1], [], []>} : vector<128x256xbf16>, vector<256x256xbf16>, vector<128x256xf32> -> vector<128x256xf32>
    %c0_14 = arith.constant 0 : index
    %c0_15 = arith.constant 0 : index
    %17 = vector.load %arg7[%c0_14, %c0_15] : memref<1x256xf32, #tpu.memory_space<vmem>>, vector<1x256xf32>
    %18 = vector.broadcast %17 : vector<1x256xf32> to vector<128x256xf32>
    %19 = arith.addf %16, %18 : vector<128x256xf32>
    %cst_16 = arith.constant 0.000000e+00 : f32
    %20 = vector.broadcast %cst_16 : f32 to vector<128x256xf32>
    %21 = arith.maximumf %19, %20 : vector<128x256xf32>
    %22 = arith.truncf %21 : vector<128x256xf32> to vector<128x256xbf16>
    %c0_17 = arith.constant 0 : index
    %c0_18 = arith.constant 0 : index
    %23 = vector.load %arg8[%c0_17, %c0_18] : memref<256x128xbf16, #tpu.memory_space<vmem>>, vector<256x128xbf16>
    %cst_19 = arith.constant dense<0.000000e+00> : vector<128x128xf32>
    %24 = tpu.matmul %22, %23, %cst_19 {dimension_numbers = #tpu.dot_dimension_numbers<[1], [0], [0], [1], [0, 0, 1, 1], [], []>} : vector<128x256xbf16>, vector<256x128xbf16>, vector<128x128xf32> -> vector<128x128xf32>
    %c0_20 = arith.constant 0 : index
    %c0_21 = arith.constant 0 : index
    %25 = vector.load %arg9[%c0_20, %c0_21] : memref<1x128xf32, #tpu.memory_space<vmem>>, vector<1x128xf32>
    %26 = vector.broadcast %25 : vector<1x128xf32> to vector<128x128xf32>
    %27 = arith.addf %24, %26 : vector<128x128xf32>
    %cst_22 = arith.constant 0.000000e+00 : f32
    %28 = vector.broadcast %cst_22 : f32 to vector<128x128xf32>
    %29 = arith.maximumf %27, %28 : vector<128x128xf32>
    %c0_23 = arith.constant 0 : index
    %c0_24 = arith.constant 0 : index
    %30 = vector.load %arg10[%c0_23, %c0_24] : memref<1x128xf32, #tpu.memory_space<vmem>>, vector<1x128xf32>
    %cst_25 = arith.constant dense<0.000000e+00> : vector<1x128xf32>
    %31 = tpu.matmul %30, %29, %cst_25 {dimension_numbers = #tpu.dot_dimension_numbers<[1], [1], [0], [0], [0, 0, 1, 0], [], []>} : vector<1x128xf32>, vector<128x128xf32>, vector<1x128xf32> -> vector<1x128xf32>
    %c0_26 = arith.constant 0 : index
    %c0_27 = arith.constant 0 : index
    %32 = memref.load %arg11[%c0_26, %c0_27] : memref<1x1xf32, #tpu.memory_space<smem>>
    %33 = vector.broadcast %32 : f32 to vector<1x128xf32>
    %34 = arith.addf %31, %33 : vector<1x128xf32>
    %c0_28 = arith.constant 0 : index
    %c0_29 = arith.constant 0 : index
    %35 = vector.load %arg12[%c0_28, %c0_29] : memref<1x128xf32, #tpu.memory_space<vmem>>, vector<1x128xf32>
    tpu.vector_store %arg12[%c0_28, %c0_29], %34 {strides = array<i32>} : memref<1x128xf32, #tpu.memory_space<vmem>>, vector<1x128xf32>,
    return
  }
  func.func @transform_0(%arg0: i32) -> (i32, i32) {
    %c0_i32 = arith.constant 0 : i32
    %c0_i32_0 = arith.constant 0 : i32
    return %arg0, %c0_i32 : i32, i32
  }
  func.func @transform_1(%arg0: i32) -> (i32, i32) {
    %c0_i32 = arith.constant 0 : i32
    %c0_i32_0 = arith.constant 0 : i32
    return %arg0, %c0_i32 : i32, i32
  }
  func.func @transform_2(%arg0: i32) -> (i32, i32) {
    %c0_i32 = arith.constant 0 : i32
    %c0_i32_0 = arith.constant 0 : i32
    %c0_i32_1 = arith.constant 0 : i32
    return %c0_i32, %c0_i32_0 : i32, i32
  }
  func.func @transform_3(%arg0: i32) -> (i32, i32) {
    %c0_i32 = arith.constant 0 : i32
    %c0_i32_0 = arith.constant 0 : i32
    %c0_i32_1 = arith.constant 0 : i32
    return %c0_i32, %c0_i32_0 : i32, i32
  }
  func.func @transform_4(%arg0: i32) -> (i32, i32) {
    %c0_i32 = arith.constant 0 : i32
    %c0_i32_0 = arith.constant 0 : i32
    %c0_i32_1 = arith.constant 0 : i32
    return %c0_i32, %c0_i32_0 : i32, i32
  }
  func.func @transform_5(%arg0: i32) -> (i32, i32) {
    %c0_i32 = arith.constant 0 : i32
    %c0_i32_0 = arith.constant 0 : i32
    %c0_i32_1 = arith.constant 0 : i32
    return %c0_i32, %c0_i32_0 : i32, i32
  }
  func.func @transform_6(%arg0: i32) -> (i32, i32) {
    %c0_i32 = arith.constant 0 : i32
    %c0_i32_0 = arith.constant 0 : i32
    %c0_i32_1 = arith.constant 0 : i32
    return %c0_i32, %c0_i32_0 : i32, i32
  }
  func.func @transform_7(%arg0: i32) -> (i32, i32) {
    %c0_i32 = arith.constant 0 : i32
    %c0_i32_0 = arith.constant 0 : i32
    %c0_i32_1 = arith.constant 0 : i32
    return %c0_i32, %c0_i32_0 : i32, i32
  }
  func.func @transform_8(%arg0: i32) -> (i32, i32) {
    %c0_i32 = arith.constant 0 : i32
    %c0_i32_0 = arith.constant 0 : i32
    %c0_i32_1 = arith.constant 0 : i32
    return %c0_i32, %c0_i32_0 : i32, i32
  }
  func.func @transform_9(%arg0: i32) -> (i32, i32) {
    %c0_i32 = arith.constant 0 : i32
    %c0_i32_0 = arith.constant 0 : i32
    %c0_i32_1 = arith.constant 0 : i32
    return %c0_i32, %c0_i32_0 : i32, i32
  }
  func.func @transform_10(%arg0: i32) -> (i32, i32) {
    %c0_i32 = arith.constant 0 : i32
    %c0_i32_0 = arith.constant 0 : i32
    %c0_i32_1 = arith.constant 0 : i32
    return %c0_i32, %c0_i32_0 : i32, i32
  }
  func.func @transform_11(%arg0: i32) -> (i32, i32) {
    %c0_i32 = arith.constant 0 : i32
    %c0_i32_0 = arith.constant 0 : i32
    return %c0_i32, %arg0 : i32, i32
  }
}

</mosaic_0001>

<bundles_post_ra>
// kernel: tpu_custom_call.1
= control target key start
LH: loop header
LB: loop body
LE: loop exit
PB: predicated region body
PF: predicated region fallthrough
CT: control target
= control target key end

     0   :  { %17 = vsyncpa [#allocation4], 0  ;;  %s1982_s0 = inlined_call_operand.vmem [shape: f32[4,24], index: 0, kind: input, shape index: {}]   ;;  %s1983_s1 = inlined_call_operand.vmem [shape: f32[4,2], index: 1, kind: input, shape index: {}]   ;;  %s1984_s2 = inlined_call_operand.hbm [shape: bf16[24,256], index: 2, kind: input, shape index: {}]   ;;  %s1985_s3 = inlined_call_operand.vmem [shape: bf16[2,256], index: 3, kind: input, shape index: {}]   ;;  %s1986_s4 = inlined_call_operand.vmem [shape: f32[1,256], index: 4, kind: input, shape index: {}]   ;;  %s1987_s5 = inlined_call_operand.hbm [shape: bf16[256,256], index: 5, kind: input, shape index: {}]   ;;  %s1988_s6 = inlined_call_operand.vmem [shape: f32[1,256], index: 6, kind: input, shape index: {}]   ;;  %s1989_s7 = inlined_call_operand.hbm [shape: bf16[256,128], index: 7, kind: input, shape index: {}]   ;;  %s1990_s8 = inlined_call_operand.vmem [shape: f32[1,128], index: 8, kind: input, shape index: {}]   ;;  %s1991_s9 = inlined_call_operand.vmem [shape: f32[1,128], index: 9, kind: input, shape index: {}]   ;;  %s1992_s10 = inlined_call_operand.<no memory space> [shape: f32[1,1], index: 10, kind: input, shape index: {}]   ;;  %s1993_s11 = inlined_call_operand.hbm [shape: f32[1,128], index: 11, kind: output, shape index: {}]  }
   0x1   :  { %18 = vsyncpa [#allocation7], 0 }
   0x2   :  { %19 = vsyncpa [#allocation5], 0  ;;  %s1612_s17 = smov [#allocation6]   ;;  %s1613_s19 = smov [#allocation3]  }
   0x3   :  { %s45_s18 = sshll.u32 %s1612_s17, 4  ;;  %s29_s20 = sshll.u32 %s1613_s19, 4  ;;  %s46_s18 = int_to_ptr.vmem [resolvable:$true] %s45_s18  ;;  %s30_s20 = int_to_ptr.vmem [resolvable:$true] %s29_s20 }
   0x4   :  { %s1534_s21 = scalar_lea.vmem %s46_s18, 4096  ;;  %p1539_p1 = scmp.lt.s32.totalorder %s46_s18, %s46_s18 }
   0x5   :  { %p1535_p0 = scmp.ne.s32.totalorder %s46_s18, %s1534_s21  ;;  %p1540_p2 = scmp.lt.s32.totalorder %s1534_s21, %s1534_s21 }
   0x7   :  { %p1541_p3 = por %p1540_p2, %p1539_p1 }
   0x9   :  { %p1542_p4 = pnand %p1541_p3, %p1535_p0 }
   0xb   :  { %1545 = shalt.err (!%p1542_p4)
}
   0xc   :  { %s1614_s22 = smov 128   ;;  %s1615_s23 = smov 8  }
   0xd   :  { %51 = dma.hbm_to_vmem [thread:$0]  %s1987_s5, 4096, %s46_s18, [#allocation7], %s1614_s22, %s1614_s22, %s1615_s23  }
   0xe   :  { %s1554_s26 = scalar_lea.vmem %s30_s20, 384  ;;  %p1559_p6 = scmp.lt.s32.totalorder %s30_s20, %s30_s20 }
   0xf   :  { %p1555_p5 = scmp.ne.s32.totalorder %s30_s20, %s1554_s26  ;;  %p1560_p7 = scmp.lt.s32.totalorder %s1554_s26, %s1554_s26 }
  0x11   :  { %p1561_p8 = por %p1560_p7, %p1559_p6 }
  0x13   :  { %p1562_p9 = pnand %p1561_p8, %p1555_p5 }
  0x15   :  { %1565 = shalt.err (!%p1562_p9)
}
  0x16   :  { %35 = dma.hbm_to_vmem [thread:$0]  %s1984_s2, 384, %s30_s20, [#allocation4], %s1614_s22, %s1614_s22, %s1615_s23  }
  0x17   :  { %s1616_s29 = smov [#allocation8]  }
  0x18   :  { %s59_s30 = sshll.u32 %s1616_s29, 4  ;;  %s60_s30 = int_to_ptr.vmem [resolvable:$true] %s59_s30 }
  0x19   :  { %s1574_s12 = scalar_lea.vmem %s60_s30, 2048  ;;  %p1579_p11 = scmp.lt.s32.totalorder %s60_s30, %s60_s30 }
  0x1a   :  { %p1575_p10 = scmp.ne.s32.totalorder %s60_s30, %s1574_s12  ;;  %p1580_p12 = scmp.lt.s32.totalorder %s1574_s12, %s1574_s12 }
  0x1c   :  { %p1581_p13 = por %p1580_p12, %p1579_p11 }
  0x1e   :  { %p1582_p0 = pnand %p1581_p13, %p1575_p10 }
  0x20   :  { %1585 = shalt.err (!%p1582_p0)
}
  0x21   :  { %s1617_s5 = smov 64   ;;  %s1618_s13 = smov 4  }
  0x22   :  { %65 = dma.hbm_to_vmem [thread:$0]  %s1989_s7, 2048, %s60_s30, [#allocation7], %s1617_s5, %s1617_s5, %s1618_s13  }
  0x23   :  { %1606 = dma.done.wait [#allocation4], 384  }
  0x24   :  { %1607 = vsyncadd [#allocation4], 4294966912 }
  0x25   :  { %1608 = dma.done.wait [#allocation7], 6144  }
  0x26   :  { %1609 = vsyncadd [#allocation7], 4294961152  ;;  %v146_v0 = vlaneseq  ;;  %v1619_v1 = vmov 1966171168   ;;  %v1620_v4 = vmov 0   ;;  %vm342_vm0 = vcmask 1043456  }
  0x27   :  { %v144_v2 = vunpack.c.l.s4 %v1619_v1  ;;  %221 = vmatprep.mubr.bf16.mxu0 %v1620_v4  ;;  %381 = vmatprep.mubr.bf16.mxu1 %v1620_v4  ;;  %vm182_vm1 = vcmask 1040384   ;;  %v132_v7 = vld [vmem:[#allocation3 + $0x10] sm:$0xff]  ;;  %v1257_v8 = vld.sshfl [vmem:[%s1985_s3] sm:$0x11 pattern:$0x75316420] }
  0x28   :  { %v1693_v3 = vshrl.u32 %v146_v0, 7  ;;  %v1270_v9 = vcombine.high %v132_v7, %v132_v7  ;;  %v1269_v10 = vcombine.low %v132_v7, %v132_v7  ;;  %v142_v11 = vcombine.high %v1257_v8, %v1257_v8  ;;  %v1459_v13 = vld [vmem:[#allocation3 + $0x4] ss:$8 sps:$4 sm:$0xff]   ;;  %v1461_v19 = vld [vmem:[#allocation3] ss:$8 sps:$4 sm:$0xff]   ;;  %v108_v24 = vld [vmem:[%s1983_s1 + $0x10] sm:$0xff] }
  0x29   :  { %v145_v5 = vunpack.c.0.s8 %v144_v2  ;;  %v106_v14 = vld [vmem:[%s1983_s1] sm:$0xff]  ;;  %v107_v18 = vld [vmem:[%s1983_s1 + $0x8] sm:$0xff]  ;;  %vm157_vm2 = vcmask 15360   ;;  %vm317_vm3 = vcmask 195584   ;;  %v109_v25 = vld [vmem:[%s1983_s1 + $0x18] sm:$0xff]  ;;  %vm1622_vm4 = vmmov 0  }
  0x2a   :  { %1271 = vmatprep.subr.msk.bf16.mxu1 %vm342_vm0, %v1270_v9  ;;  %v344_v15 = vsel %vm342_vm0, %v1269_v10, 0  ;;  %v82_v20 = vld [vmem:[%s1982_s0] sm:$0xff]  ;;  %v83_v21 = vld [vmem:[%s1982_s0 + $0x8] sm:$0xff]  ;;  %v122_v22 = vpack.c.bf16 %v107_v18, %v106_v14  ;;  %v84_v26 = vld [vmem:[%s1982_s0 + $0x10] sm:$0xff]  ;;  %v123_v28 = vpack.c.bf16 %v109_v25, %v108_v24  ;;  %s1623_s16 = smov [#allocation9]  }
  0x2b   :  { %v148_v6 = vsub.s32 %v145_v5, %v1693_v3  ;;  %362 = vmatpush1.bf16.msra.mxu1 %v344_v15  ;;  %v98_v23 = vpack.c.bf16 %v83_v21, %v82_v20  ;;  %v85_v27 = vld [vmem:[%s1982_s0 + $0x18] sm:$0xff]  ;;  %v1462_v29 = vld [vmem:[#allocation6 + $0x70] ss:$8 sps:$4 sm:$0xff]   ;;  %v1464_v30 = vld [vmem:[#allocation6 + $0x74] ss:$8 sps:$4 sm:$0xff]   ;;  %s1247_s17 = sshll.u32 %s1623_s16, 4  ;;  %s1248_s17 = int_to_ptr.vmem [resolvable:$true] %s1247_s17 }
  0x2c   :  { %363 = vmatprep.subr.bf16.mxu1 %v1459_v13  ;;  %v99_v31 = vpack.c.bf16 %v85_v27, %v84_v26  ;;  %v1467_v32 = vld [vmem:[#allocation6 + $0x64] ss:$8 sps:$4 sm:$0xff]   ;;  %v111_v34 = vld [vmem:[%s1983_s1 + $0x28] sm:$0xff]  ;;  %v1465_v35 = vld [vmem:[#allocation6 + $0x60] ss:$8 sps:$4 sm:$0xff]   ;;  %s1586_s18 = scalar_lea.vmem %s1248_s17, 16  ;;  %p1591_p2 = scmp.lt.s32.totalorder %s1248_s17, %s1248_s17 }
  0x2d   :  { %v149_v12 = vrot.slane %v1257_v8, %v148_v6  ;;  %v156_v16 = vrot.slane %v142_v11, %v148_v6  ;;  %v110_v33 = vld [vmem:[%s1983_s1 + $0x20] sm:$0xff]  ;;  %v1470_v37 = vld [vmem:[#allocation6 + $0x54] ss:$8 sps:$4 sm:$0xff]   ;;  %v1468_v40 = vld [vmem:[#allocation6 + $0x50] ss:$8 sps:$4 sm:$0xff]   ;;  %p1587_p1 = scmp.ne.s32.totalorder %s1248_s17, %s1586_s18  ;;  %s1590_s19 = scalar_lea.vmem %s1248_s17, 32 }
  0x2e   :  { %v86_v36 = vld [vmem:[%s1982_s0 + $0x20] sm:$0xff]  ;;  %v87_v38 = vld [vmem:[%s1982_s0 + $0x28] sm:$0xff]  ;;  %v124_v39 = vpack.c.bf16 %v111_v34, %v110_v33  ;;  %v112_v43 = vld [vmem:[%s1983_s1 + $0x30] sm:$0xff]  ;;  %p1592_p3 = scmp.lt.s32.totalorder %s1590_s19, %s1586_s18 }
  0x2f   :  { %v184_v17 = vsel %vm182_vm1, %v149_v12, 0  ;;  %1258 = vmatprep.subr.msk.bf16.mxu0 %vm182_vm1, %v156_v16  ;;  %364 = vmatpush1.bf16.msra.mxu1 %v1461_v19  ;;  %v100_v41 = vpack.c.bf16 %v87_v38, %v86_v36  ;;  %v1473_v42 = vld [vmem:[#allocation6 + $0x44] ss:$8 sps:$4 sm:$0xff]   ;;  %v88_v45 = vld [vmem:[%s1982_s0 + $0x30] sm:$0xff]  ;;  %v1471_v46 = vld [vmem:[#allocation6 + $0x40] ss:$8 sps:$4 sm:$0xff]  }
  0x30   :  { %204 = vmatpush1.bf16.msra.mxu0 %v184_v17  ;;  %v113_v44 = vld [vmem:[%s1983_s1 + $0x38] sm:$0xff]  ;;  %v1476_v48 = vld [vmem:[#allocation6 + $0x34] ss:$8 sps:$4 sm:$0xff]   ;;  %v1474_v49 = vld [vmem:[#allocation6 + $0x30] ss:$8 sps:$4 sm:$0xff]   ;;  %p1593_p4 = por %p1592_p3, %p1591_p2 }
  0x31   :  { %758 = vmatprep.subr.bf16.mxu0 %v1464_v30  ;;  %v89_v47 = vld [vmem:[%s1982_s0 + $0x38] sm:$0xff]  ;;  %v125_v50 = vpack.c.bf16 %v113_v44, %v112_v43  ;;  %v114_v53 = vld [vmem:[%s1983_s1 + $0x40] sm:$0xff]  ;;  %v115_v54 = vld [vmem:[%s1983_s1 + $0x48] sm:$0xff] }
  0x32   :  { %1272 = vmatmul.mubr.msk.bf16.vlgmr.msra.gmra.mxu1 %vm317_vm3, %v98_v23  ;;  %v1479_v51 = vld [vmem:[#allocation6 + $0x24] ss:$8 sps:$4 sm:$0xff]   ;;  %v101_v52 = vpack.c.bf16 %v89_v47, %v88_v45  ;;  %v1477_v55 = vld [vmem:[#allocation6 + $0x20] ss:$8 sps:$4 sm:$0xff]   ;;  %v1482_v56 = vld [vmem:[#allocation6 + $0x14] ss:$8 sps:$4 sm:$0xff]   ;;  %v126_v60 = vpack.c.bf16 %v115_v54, %v114_v53  ;;  %p1594_p5 = pnand %p1593_p4, %p1587_p1 }
  0x33   :  { %1259 = vmatmul.mubr.msk.bf16.vlgmr.msra.gmra.mxu0 %vm157_vm2, %v122_v22  ;;  %391 = vmatprep.mubr.bf16.mxu1 %v1620_v4  ;;  %v90_v57 = vld [vmem:[%s1982_s0 + $0x40] sm:$0xff]  ;;  %v91_v58 = vld [vmem:[%s1982_s0 + $0x48] sm:$0xff]  ;;  %v116_v63 = vld [vmem:[%s1983_s1 + $0x50] sm:$0xff] }
  0x34   :  { %231 = vmatprep.mubr.bf16.mxu0 %v1620_v4  ;;  %759 = vmatpush1.bf16.msra.mxu0 %v1462_v29  ;;  %v1480_v59 = vld [vmem:[#allocation6 + $0x10] ss:$8 sps:$4 sm:$0xff]   ;;  %v1485_v61 = vld [vmem:[#allocation6 + $0x4] ss:$8 sps:$4 sm:$0xff]   ;;  %v102_v62 = vpack.c.bf16 %v91_v58, %v90_v57  ;;  %v1483_v1 = vld [vmem:[#allocation6] ss:$8 sps:$4 sm:$0xff]  }
  0x35   :  { %760 = vmatprep.subr.bf16.mxu0 %v1467_v32  ;;  %v117_v0 = vld [vmem:[%s1983_s1 + $0x58] sm:$0xff]  ;;  %v1488_v2 = vld [vmem:[#allocation6 + $0xf4] ss:$8 sps:$4 sm:$0xff]   ;;  %v1486_v8 = vld [vmem:[#allocation6 + $0xf0] ss:$8 sps:$4 sm:$0xff]  }
  0x36   :  { %v92_v5 = vld [vmem:[%s1982_s0 + $0x50] sm:$0xff]  ;;  %v93_v6 = vld [vmem:[%s1982_s0 + $0x58] sm:$0xff]  ;;  %v127_v7 = vpack.c.bf16 %v117_v0, %v116_v63  ;;  %v118_v11 = vld [vmem:[%s1983_s1 + $0x60] sm:$0xff] }
  0x37   :  { %v103_v9 = vpack.c.bf16 %v93_v6, %v92_v5  ;;  %v1491_v10 = vld [vmem:[#allocation6 + $0xe4] ss:$8 sps:$4 sm:$0xff]   ;;  %v119_v12 = vld [vmem:[%s1983_s1 + $0x68] sm:$0xff]  ;;  %v1489_v13 = vld [vmem:[#allocation6 + $0xe0] ss:$8 sps:$4 sm:$0xff]  }
  0x38   :  { %761 = vmatpush1.bf16.msra.mxu0 %v1465_v35  ;;  %v1494_v14 = vld [vmem:[#allocation6 + $0xd4] ss:$8 sps:$4 sm:$0xff]   ;;  %v94_v15 = vld [vmem:[%s1982_s0 + $0x60] sm:$0xff]  ;;  %v128_v17 = vpack.c.bf16 %v119_v12, %v118_v11  ;;  %v1492_v18 = vld [vmem:[#allocation6 + $0xd0] ss:$8 sps:$4 sm:$0xff]  }
  0x39   :  { %762 = vmatprep.subr.bf16.mxu0 %v1470_v37  ;;  %v95_v16 = vld [vmem:[%s1982_s0 + $0x68] sm:$0xff]  ;;  %v1497_v20 = vld [vmem:[#allocation6 + $0xc4] ss:$8 sps:$4 sm:$0xff]   ;;  %v120_v21 = vld [vmem:[%s1983_s1 + $0x70] sm:$0xff] }
  0x3a   :  { %1273 = vmatmul.mubr.msk.bf16.gmra.mxu1 %vm317_vm3, %v99_v31  ;;  %v104_v19 = vpack.c.bf16 %v95_v16, %v94_v15  ;;  %v121_v22 = vld [vmem:[%s1983_s1 + $0x78] sm:$0xff]  ;;  %v96_v24 = vld [vmem:[%s1982_s0 + $0x70] sm:$0xff]  ;;  %v1512_v37 = vld [vmem:[#allocation8 + $0x70] sm:$0xff]  }
  0x3b   :  { %1260 = vmatmul.mubr.msk.bf16.gmra.mxu0 %vm157_vm2, %v123_v28  ;;  %401 = vmatprep.mubr.bf16.mxu1 %v1620_v4  ;;  %v1495_v23 = vld [vmem:[#allocation6 + $0xc0] ss:$8 sps:$4 sm:$0xff]   ;;  %v129_v26 = vpack.c.bf16 %v121_v22, %v120_v21  ;;  %v1500_v28 = vld [vmem:[#allocation6 + $0xb4] ss:$8 sps:$4 sm:$0xff]   ;;  %v1498_v29 = vld [vmem:[#allocation6 + $0xb0] ss:$8 sps:$4 sm:$0xff]  }
  0x3c   :  { %241 = vmatprep.mubr.bf16.mxu0 %v1620_v4  ;;  %763 = vmatpush1.bf16.msra.mxu0 %v1468_v40  ;;  %v97_v25 = vld [vmem:[%s1982_s0 + $0x78] sm:$0xff]  ;;  %v1506_v31 = vld [vmem:[#allocation6 + $0x94] ss:$8 sps:$4 sm:$0xff]   ;;  %v1504_v32 = vld [vmem:[#allocation6 + $0x90] ss:$8 sps:$4 sm:$0xff]  }
  0x3d   :  { %764 = vmatprep.subr.bf16.mxu0 %v1473_v42  ;;  %v105_v27 = vpack.c.bf16 %v97_v25, %v96_v24  ;;  %v1501_v30 = vld [vmem:[#allocation6 + $0xa0] ss:$8 sps:$4 sm:$0xff]   ;;  %v1509_v33 = vld [vmem:[#allocation6 + $0x84] ss:$8 sps:$4 sm:$0xff]   ;;  %v1510_v35 = vld [vmem:[#allocation8 + $0x78] sm:$0xff]  }
  0x3e   :  { %v1507_v34 = vld [vmem:[#allocation6 + $0x80] ss:$8 sps:$4 sm:$0xff]   ;;  %v1511_v36 = vld [vmem:[#allocation8 + $0x38] sm:$0xff]   ;;  %1329 = vmatprep.subr.bf16.mxu1 %v1510_v35  ;;  %v1513_v38 = vld [vmem:[#allocation8 + $0x30] sm:$0xff]  }
  0x3f   :  { %1330 = vmatpush3.bf16.msra.mxu1 %v1511_v36  ;;  %v1515_v40 = vld [vmem:[#allocation8 + $0x28] sm:$0xff]   ;;  %v1517_v42 = vld [vmem:[#allocation8 + $0x20] sm:$0xff]   ;;  %v1518_v43 = vld [vmem:[#allocation8 + $0x58] sm:$0xff]  }
  0x40   :  { %765 = vmatpush1.bf16.msra.mxu0 %v1471_v46  ;;  %1331 = vmatprep.subr.bf16.mxu1 %v1512_v37  ;;  %v1519_v44 = vld [vmem:[#allocation8 + $0x18] sm:$0xff]   ;;  %v1520_v45 = vld [vmem:[#allocation8 + $0x50] sm:$0xff]   ;;  %v1522_v47 = vld [vmem:[#allocation8 + $0x48] sm:$0xff]  }
  0x41   :  { %766 = vmatprep.subr.bf16.mxu0 %v1476_v48  ;;  %v1521_v46 = vld [vmem:[#allocation8 + $0x10] sm:$0xff]   ;;  %v1523_v48 = vld [vmem:[#allocation8 + $0x8] sm:$0xff]  }
  0x42   :  { %1274 = vmatmul.mubr.msk.bf16.gmra.mxu1 %vm317_vm3, %v100_v41  ;;  %v1516_v41 = vld [vmem:[#allocation8 + $0x60] sm:$0xff]   ;;  %v462_v54 = vld [vmem:[%s1986_s4] sm:$0x3] }
  0x43   :  { %1261 = vmatmul.mubr.msk.bf16.gmra.mxu0 %vm157_vm2, %v124_v39  ;;  %411 = vmatprep.mubr.bf16.mxu1 %v1620_v4  ;;  %v1514_v39 = vld [vmem:[#allocation8 + $0x68] sm:$0xff]  }
  0x44   :  { %251 = vmatprep.mubr.bf16.mxu0 %v1620_v4  ;;  %767 = vmatpush1.bf16.msra.mxu0 %v1474_v49 }
  0x45   :  { %768 = vmatprep.subr.bf16.mxu0 %v1479_v51  ;;  %1332 = vmatpush3.bf16.msra.mxu1 %v1513_v38  ;;  %v466_v51 = vsub.s32 0, %v1693_v3 }
  0x46   :  { %1333 = vmatprep.subr.bf16.mxu1 %v1514_v39 }
  0x48   :  { %769 = vmatpush1.bf16.msra.mxu0 %v1477_v55 }
  0x49   :  { %770 = vmatprep.subr.bf16.mxu0 %v1482_v56  ;;  %1334 = vmatpush3.bf16.msra.mxu1 %v1515_v40 }
  0x4a   :  { %1275 = vmatmul.mubr.msk.bf16.gmra.mxu1 %vm317_vm3, %v101_v52  ;;  %1335 = vmatprep.subr.bf16.mxu1 %v1516_v41 }
  0x4b   :  { %1262 = vmatmul.mubr.msk.bf16.gmra.mxu0 %vm157_vm2, %v125_v50  ;;  %421 = vmatprep.mubr.bf16.mxu1 %v1620_v4  ;;  %v470_v50 = vsub.s32 1, %v1693_v3 }
  0x4c   :  { %261 = vmatprep.mubr.bf16.mxu0 %v1620_v4  ;;  %771 = vmatpush1.bf16.msra.mxu0 %v1480_v59  ;;  %v1840_v59 = vrot.slane %v462_v54, %v466_v51 }
  0x4d   :  { %772 = vmatprep.subr.bf16.mxu0 %v1485_v61  ;;  %1336 = vmatpush3.bf16.msra.mxu1 %v1517_v42  ;;  %v1836_v57 = vrot.slane %v462_v54, %v470_v50 }
  0x4e   :  { %1337 = vmatprep.subr.bf16.mxu1 %v1518_v43 }
  0x50   :  { %773 = vmatpush1.bf16.msra.mxu0 %v1483_v1 }
  0x51   :  { %774 = vmatprep.subr.bf16.mxu0 %v1488_v2  ;;  %1338 = vmatpush3.bf16.msra.mxu1 %v1519_v44 }
  0x52   :  { %1276 = vmatmul.mubr.msk.bf16.gmra.mxu1 %vm317_vm3, %v102_v62  ;;  %1339 = vmatprep.subr.bf16.mxu1 %v1520_v45 }
  0x53   :  { %1263 = vmatmul.mubr.msk.bf16.gmra.mxu0 %vm157_vm2, %v126_v60  ;;  %431 = vmatprep.mubr.bf16.mxu1 %v1620_v4 }
  0x54   :  { %271 = vmatprep.mubr.bf16.mxu0 %v1620_v4  ;;  %775 = vmatpush2.bf16.msra.mxu0 %v1486_v8 }
  0x55   :  { %776 = vmatprep.subr.bf16.mxu0 %v1491_v10  ;;  %1340 = vmatpush3.bf16.msra.mxu1 %v1521_v46 }
  0x56   :  { %1341 = vmatprep.subr.bf16.mxu1 %v1522_v47 }
  0x58   :  { %777 = vmatpush2.bf16.msra.mxu0 %v1489_v13 }
  0x59   :  { %778 = vmatprep.subr.bf16.mxu0 %v1494_v14  ;;  %1342 = vmatpush3.bf16.msra.mxu1 %v1523_v48 }
  0x5a   :  { %1277 = vmatmul.mubr.msk.bf16.gmra.mxu1 %vm317_vm3, %v103_v9 }
  0x5b   :  { %1264 = vmatmul.mubr.msk.bf16.gmra.mxu0 %vm157_vm2, %v127_v7  ;;  %441 = vmatprep.mubr.bf16.mxu1 %v1620_v4 }
  0x5c   :  { %281 = vmatprep.mubr.bf16.mxu0 %v1620_v4  ;;  %779 = vmatpush2.bf16.msra.mxu0 %v1492_v18 }
  0x5d   :  { %780 = vmatprep.subr.bf16.mxu0 %v1497_v20 }
  0x60   :  { %781 = vmatpush2.bf16.msra.mxu0 %v1495_v23 }
  0x61   :  { %782 = vmatprep.subr.bf16.mxu0 %v1500_v28 }
  0x62   :  { %1278 = vmatmul.mubr.msk.bf16.gmra.mxu1 %vm317_vm3, %v104_v19 }
  0x63   :  { %1265 = vmatmul.mubr.msk.bf16.gmra.mxu0 %vm157_vm2, %v128_v17  ;;  %451 = vmatprep.mubr.bf16.mxu1 %v1620_v4 }
  0x64   :  { %291 = vmatprep.mubr.bf16.mxu0 %v1620_v4  ;;  %783 = vmatpush2.bf16.msra.mxu0 %v1498_v29  ;;  %v1503_v4 = vld [vmem:[#allocation6 + $0xa4] ss:$8 sps:$4 sm:$0xff]  }
  0x65   :  { %784 = vmatprep.subr.bf16.mxu0 %v1503_v4 }
  0x68   :  { %785 = vmatpush2.bf16.msra.mxu0 %v1501_v30 }
  0x69   :  { %786 = vmatprep.subr.bf16.mxu0 %v1506_v31 }
  0x6a   :  { %1279 = vmatmul.mubr.msk.bf16.gmra.mxu1 %vm317_vm3, %v105_v27 }
  0x6b   :  { %1266 = vmatmul.mubr.msk.bf16.gmra.mxu0 %vm157_vm2, %v129_v26 }
  0x6c   :  { %787 = vmatpush2.bf16.msra.mxu0 %v1504_v32 }
  0x6d   :  { %788 = vmatprep.subr.bf16.mxu0 %v1509_v33 }
  0x70   :  { %789 = vmatpush2.bf16.msra.mxu0 %v1507_v34 }
  0xf2   :  { %v383_v53 = vpop.f32.mrf.mxu1 }
  0xf3   :  { %v223_v49 = vpop.f32.mrf.mxu0 }
  0xf4   :  { %v385_v56 = vpop.f32.mrf.mxu1  ;;  %v384_v60 = vadd.f32 %v383_v53, %v223_v49 }
  0xf5   :  { %v225_v52 = vpop.f32.mrf.mxu0 }
  0xf6   :  { %v386_v58 = vadd.f32 %v385_v56, %v225_v52  ;;  %v387_v62 = vpop.f32.mrf.mxu1  ;;  %v474_v7 = vadd.f32 %v1840_v59, %v384_v60 }
  0xf7   :  { %v227_v55 = vpop.f32.mrf.mxu0 }
  0xf8   :  { %v388_v63 = vadd.f32 %v387_v62, %v227_v55  ;;  %v389_v1 = vpop.f32.mrf.mxu1  ;;  %v475_v2 = vadd.f32 %v1836_v57, %v386_v58  ;;  %v506_v17 = vmax.f32 %v474_v7, 0.0 }
  0xf9   :  { %v229_v61 = vpop.f32.mrf.mxu0 }
  0xfa   :  { %v476_v5 = vadd.f32 %v1840_v59, %v388_v63  ;;  %v390_v6 = vadd.f32 %v389_v1, %v229_v61  ;;  %v393_v9 = vpop.f32.mrf.mxu1  ;;  %v507_v14 = vmax.f32 %v475_v2, 0.0 }
  0xfb   :  { %v233_v0 = vpop.f32.mrf.mxu0 }
  0xfc   :  { %v477_v10 = vadd.f32 %v1836_v57, %v390_v6  ;;  %v508_v11 = vmax.f32 %v476_v5, 0.0  ;;  %v395_v13 = vpop.f32.mrf.mxu1  ;;  %v394_v18 = vadd.f32 %v393_v9, %v233_v0 }
  0xfd   :  { %v235_v8 = vpop.f32.mrf.mxu0 }
  0xfe   :  { %v509_v15 = vmax.f32 %v477_v10, 0.0  ;;  %v396_v16 = vadd.f32 %v395_v13, %v235_v8  ;;  %v397_v20 = vpop.f32.mrf.mxu1  ;;  %v538_v23 = vpack.c.bf16 %v508_v11, %v506_v17  ;;  %v478_v29 = vadd.f32 %v1840_v59, %v394_v18 }
  0xff   :  { %v237_v12 = vpop.f32.mrf.mxu0 }
 0x100   :  { %v398_v21 = vadd.f32 %v397_v20, %v237_v12  ;;  %v539_v22 = vpack.c.bf16 %v509_v15, %v507_v14  ;;  %v399_v25 = vpop.f32.mrf.mxu1  ;;  %v479_v26 = vadd.f32 %v1836_v57, %v396_v16  ;;  %v510_v38 = vmax.f32 %v478_v29, 0.0 }
 0x101   :  { %v239_v19 = vpop.f32.mrf.mxu0 }
 0x102   :  { %v480_v27 = vadd.f32 %v1840_v59, %v398_v21  ;;  %v400_v28 = vadd.f32 %v399_v25, %v239_v19  ;;  %790 = vmatprep.mubr.bf16.mxu0 %v539_v22  ;;  %v403_v30 = vpop.f32.mrf.mxu1  ;;  %v511_v35 = vmax.f32 %v479_v26, 0.0 }
 0x103   :  { %v243_v24 = vpop.f32.mrf.mxu0  ;;  %791 = vmatmul.mubr.bf16.vlgmr.msra.gmra.mxu0 %v538_v23 }
 0x104   :  { %v481_v31 = vadd.f32 %v1836_v57, %v400_v28  ;;  %v512_v32 = vmax.f32 %v480_v27, 0.0  ;;  %v405_v34 = vpop.f32.mrf.mxu1  ;;  %v404_v39 = vadd.f32 %v403_v30, %v243_v24 }
 0x105   :  { %v245_v4 = vpop.f32.mrf.mxu0 }
 0x106   :  { %v513_v36 = vmax.f32 %v481_v31, 0.0  ;;  %v406_v37 = vadd.f32 %v405_v34, %v245_v4  ;;  %v407_v41 = vpop.f32.mrf.mxu1  ;;  %v540_v46 = vpack.c.bf16 %v512_v32, %v510_v38  ;;  %v482_v52 = vadd.f32 %v1840_v59, %v404_v39 }
 0x107   :  { %v247_v33 = vpop.f32.mrf.mxu0 }
 0x108   :  { %v408_v42 = vadd.f32 %v407_v41, %v247_v33  ;;  %v541_v43 = vpack.c.bf16 %v513_v36, %v511_v35  ;;  %v409_v45 = vpop.f32.mrf.mxu1  ;;  %v483_v47 = vadd.f32 %v1836_v57, %v406_v37  ;;  %v514_v0 = vmax.f32 %v482_v52, 0.0 }
 0x109   :  { %v249_v40 = vpop.f32.mrf.mxu0 }
 0x10a   :  { %v484_v48 = vadd.f32 %v1840_v59, %v408_v42  ;;  %v410_v49 = vadd.f32 %v409_v45, %v249_v40  ;;  %800 = vmatprep.mubr.bf16.mxu0 %v541_v43  ;;  %v413_v54 = vpop.f32.mrf.mxu1  ;;  %v515_v61 = vmax.f32 %v483_v47, 0.0 }
 0x10b   :  { %v253_v44 = vpop.f32.mrf.mxu0  ;;  %801 = vmatmul.mubr.bf16.gmra.mxu0 %v540_v46 }
 0x10c   :  { %v485_v55 = vadd.f32 %v1836_v57, %v410_v49  ;;  %v516_v56 = vmax.f32 %v484_v48, 0.0  ;;  %v415_v60 = vpop.f32.mrf.mxu1  ;;  %v414_v1 = vadd.f32 %v413_v54, %v253_v44 }
 0x10d   :  { %v255_v53 = vpop.f32.mrf.mxu0 }
 0x10e   :  { %v517_v62 = vmax.f32 %v485_v55, 0.0  ;;  %v416_v63 = vadd.f32 %v415_v60, %v255_v53  ;;  %v417_v5 = vpop.f32.mrf.mxu1  ;;  %v542_v10 = vpack.c.bf16 %v516_v56, %v514_v0  ;;  %v486_v14 = vadd.f32 %v1840_v59, %v414_v1 }
 0x10f   :  { %v257_v58 = vpop.f32.mrf.mxu0 }
 0x110   :  { %v418_v6 = vadd.f32 %v417_v5, %v257_v58  ;;  %v543_v7 = vpack.c.bf16 %v517_v62, %v515_v61  ;;  %v419_v9 = vpop.f32.mrf.mxu1  ;;  %v487_v11 = vadd.f32 %v1836_v57, %v416_v63  ;;  %v518_v24 = vmax.f32 %v486_v14, 0.0 }
 0x111   :  { %v259_v2 = vpop.f32.mrf.mxu0 }
 0x112   :  { %v488_v12 = vadd.f32 %v1840_v59, %v418_v6  ;;  %v420_v13 = vadd.f32 %v419_v9, %v259_v2  ;;  %810 = vmatprep.mubr.bf16.mxu0 %v543_v7  ;;  %v423_v16 = vpop.f32.mrf.mxu1  ;;  %v519_v21 = vmax.f32 %v487_v11, 0.0 }
 0x113   :  { %v263_v8 = vpop.f32.mrf.mxu0  ;;  %811 = vmatmul.mubr.bf16.gmra.mxu0 %v542_v10 }
 0x114   :  { %v489_v17 = vadd.f32 %v1836_v57, %v420_v13  ;;  %v520_v18 = vmax.f32 %v488_v12, 0.0  ;;  %v425_v20 = vpop.f32.mrf.mxu1  ;;  %v424_v25 = vadd.f32 %v423_v16, %v263_v8 }
 0x115   :  { %v265_v15 = vpop.f32.mrf.mxu0 }
 0x116   :  { %v521_v22 = vmax.f32 %v489_v17, 0.0  ;;  %v426_v23 = vadd.f32 %v425_v20, %v265_v15  ;;  %v427_v27 = vpop.f32.mrf.mxu1  ;;  %v544_v31 = vpack.c.bf16 %v520_v18, %v518_v24  ;;  %v490_v35 = vadd.f32 %v1840_v59, %v424_v25 }
 0x117   :  { %v267_v19 = vpop.f32.mrf.mxu0 }
 0x118   :  { %v428_v28 = vadd.f32 %v427_v27, %v267_v19  ;;  %v545_v29 = vpack.c.bf16 %v521_v22, %v519_v21  ;;  %v429_v30 = vpop.f32.mrf.mxu1  ;;  %v491_v32 = vadd.f32 %v1836_v57, %v426_v23  ;;  %v522_v45 = vmax.f32 %v490_v35, 0.0 }
 0x119   :  { %v269_v26 = vpop.f32.mrf.mxu0 }
 0x11a   :  { %v492_v33 = vadd.f32 %v1840_v59, %v428_v28  ;;  %v430_v34 = vadd.f32 %v429_v30, %v269_v26  ;;  %820 = vmatprep.mubr.bf16.mxu0 %v545_v29  ;;  %v433_v37 = vpop.f32.mrf.mxu1  ;;  %v523_v42 = vmax.f32 %v491_v32, 0.0 }
 0x11b   :  { %v273_v4 = vpop.f32.mrf.mxu0  ;;  %821 = vmatmul.mubr.bf16.gmra.mxu0 %v544_v31 }
 0x11c   :  { %v493_v38 = vadd.f32 %v1836_v57, %v430_v34  ;;  %v524_v39 = vmax.f32 %v492_v33, 0.0  ;;  %v435_v41 = vpop.f32.mrf.mxu1  ;;  %v434_v46 = vadd.f32 %v433_v37, %v273_v4 }
 0x11d   :  { %v275_v36 = vpop.f32.mrf.mxu0 }
 0x11e   :  { %v525_v43 = vmax.f32 %v493_v38, 0.0  ;;  %v436_v44 = vadd.f32 %v435_v41, %v275_v36  ;;  %v437_v48 = vpop.f32.mrf.mxu1  ;;  %v546_v55 = vpack.c.bf16 %v524_v39, %v522_v45  ;;  %v494_v61 = vadd.f32 %v1840_v59, %v434_v46 }
 0x11f   :  { %v277_v40 = vpop.f32.mrf.mxu0 }
 0x120   :  { %v438_v49 = vadd.f32 %v437_v48, %v277_v40  ;;  %v547_v52 = vpack.c.bf16 %v525_v43, %v523_v42  ;;  %v439_v54 = vpop.f32.mrf.mxu1  ;;  %v495_v56 = vadd.f32 %v1836_v57, %v436_v44  ;;  %v526_v9 = vmax.f32 %v494_v61, 0.0 }
 0x121   :  { %v279_v47 = vpop.f32.mrf.mxu0 }
 0x122   :  { %v496_v58 = vadd.f32 %v1840_v59, %v438_v49  ;;  %v440_v60 = vadd.f32 %v439_v54, %v279_v47  ;;  %830 = vmatprep.mubr.bf16.mxu0 %v547_v52  ;;  %v443_v63 = vpop.f32.mrf.mxu1  ;;  %v527_v6 = vmax.f32 %v495_v56, 0.0  ;;  %v1524_v49 = vld [vmem:[#allocation8 + $0x40] sm:$0xff]  }
 0x123   :  { %v283_v53 = vpop.f32.mrf.mxu0  ;;  %831 = vmatmul.mubr.bf16.gmra.mxu0 %v546_v55  ;;  %v1525_v52 = vld [vmem:[#allocation8] sm:$0xff]   ;;  %1343 = vmatprep.subr.bf16.mxu1 %v1524_v49 }
 0x124   :  { %v497_v0 = vadd.f32 %v1836_v57, %v440_v60  ;;  %v528_v1 = vmax.f32 %v496_v58, 0.0  ;;  %v445_v5 = vpop.f32.mrf.mxu1  ;;  %v444_v10 = vadd.f32 %v443_v63, %v283_v53  ;;  %1344 = vmatpush3.bf16.msra.mxu1 %v1525_v52  ;;  %v586_v53 = vld [vmem:[%s1988_s6] sm:$0x3] }
 0x125   :  { %v285_v62 = vpop.f32.mrf.mxu0  ;;  %v1883_v54 = vrot.slane %v586_v53, %v466_v51 }
 0x126   :  { %v529_v7 = vmax.f32 %v497_v0, 0.0  ;;  %v446_v8 = vadd.f32 %v445_v5, %v285_v62  ;;  %v447_v12 = vpop.f32.mrf.mxu1  ;;  %v548_v17 = vpack.c.bf16 %v528_v1, %v526_v9  ;;  %v498_v21 = vadd.f32 %v1840_v59, %v444_v10 }
 0x127   :  { %v287_v2 = vpop.f32.mrf.mxu0 }
 0x128   :  { %v448_v13 = vadd.f32 %v447_v12, %v287_v2  ;;  %v549_v14 = vpack.c.bf16 %v529_v7, %v527_v6  ;;  %v449_v16 = vpop.f32.mrf.mxu1  ;;  %v499_v18 = vadd.f32 %v1836_v57, %v446_v8  ;;  %v530_v30 = vmax.f32 %v498_v21, 0.0 }
 0x129   :  { %v289_v11 = vpop.f32.mrf.mxu0 }
 0x12a   :  { %v500_v19 = vadd.f32 %v1840_v59, %v448_v13  ;;  %v450_v20 = vadd.f32 %v449_v16, %v289_v11  ;;  %840 = vmatprep.mubr.bf16.mxu0 %v549_v14  ;;  %v453_v23 = vpop.f32.mrf.mxu1  ;;  %v531_v28 = vmax.f32 %v499_v18, 0.0 }
 0x12b   :  { %v293_v15 = vpop.f32.mrf.mxu0  ;;  %841 = vmatmul.mubr.bf16.gmra.mxu0 %v548_v17 }
 0x12c   :  { %v501_v24 = vadd.f32 %v1836_v57, %v450_v20  ;;  %v532_v25 = vmax.f32 %v500_v19, 0.0  ;;  %v455_v27 = vpop.f32.mrf.mxu1  ;;  %v454_v31 = vadd.f32 %v453_v23, %v293_v15 }
 0x12d   :  { %v295_v22 = vpop.f32.mrf.mxu0 }
 0x12e   :  { %v533_v29 = vmax.f32 %v501_v24, 0.0  ;;  %v456_v4 = vadd.f32 %v455_v27, %v295_v22  ;;  %v457_v32 = vpop.f32.mrf.mxu1  ;;  %v550_v37 = vpack.c.bf16 %v532_v25, %v530_v30  ;;  %v502_v41 = vadd.f32 %v1840_v59, %v454_v31 }
 0x12f   :  { %v297_v26 = vpop.f32.mrf.mxu0 }
 0x130   :  { %v458_v33 = vadd.f32 %v457_v32, %v297_v26  ;;  %v551_v34 = vpack.c.bf16 %v533_v29, %v531_v28  ;;  %v459_v36 = vpop.f32.mrf.mxu1  ;;  %v503_v38 = vadd.f32 %v1836_v57, %v456_v4  ;;  %v534_v46 = vmax.f32 %v502_v41, 0.0 }
 0x131   :  { %v299_v35 = vpop.f32.mrf.mxu0 }
 0x132   :  { %v504_v39 = vadd.f32 %v1840_v59, %v458_v33  ;;  %v460_v40 = vadd.f32 %v459_v36, %v299_v35  ;;  %850 = vmatprep.mubr.bf16.mxu0 %v551_v34  ;;  %v535_v44 = vmax.f32 %v503_v38, 0.0 }
 0x133   :  { %851 = vmatmul.mubr.bf16.gmra.mxu0 %v550_v37 }
 0x134   :  { %v505_v42 = vadd.f32 %v1836_v57, %v460_v40  ;;  %v536_v43 = vmax.f32 %v504_v39, 0.0  ;;  %v1879_v57 = vrot.slane %v586_v53, %v470_v50 }
 0x136   :  { %v537_v45 = vmax.f32 %v505_v42, 0.0  ;;  %v552_v48 = vpack.c.bf16 %v536_v43, %v534_v46 }
 0x138   :  { %v553_v47 = vpack.c.bf16 %v537_v45, %v535_v44 }
 0x13a   :  { %860 = vmatprep.mubr.bf16.mxu0 %v553_v47 }
 0x13b   :  { %861 = vmatmul.mubr.bf16.gmra.mxu0 %v552_v48 }
 0x1c3   :  { %v792_v59 = vpop.f32.mrf.mxu0 }
 0x1c4   :  { %v793_v61 = vadd.f32 %v792_v59, %v1883_v54 }
 0x1c5   :  { %v794_v55 = vpop.f32.mrf.mxu0 }
 0x1c6   :  { %v795_v58 = vadd.f32 %v794_v55, %v1879_v57  ;;  %v871_v5 = vmax.f32 %v793_v61, 0.0 }
 0x1c7   :  { %v796_v56 = vpop.f32.mrf.mxu0 }
 0x1c8   :  { %v797_v60 = vadd.f32 %v796_v56, %v1883_v54  ;;  %v872_v2 = vmax.f32 %v795_v58, 0.0 }
 0x1c9   :  { %v798_v62 = vpop.f32.mrf.mxu0 }
 0x1ca   :  { %v799_v63 = vadd.f32 %v798_v62, %v1879_v57  ;;  %v873_v0 = vmax.f32 %v797_v60, 0.0 }
 0x1cb   :  { %v802_v1 = vpop.f32.mrf.mxu0 }
 0x1cc   :  { %v874_v50 = vmax.f32 %v799_v63, 0.0  ;;  %v903_v51 = vpack.c.bf16 %v873_v0, %v871_v5  ;;  %v803_v10 = vadd.f32 %v802_v1, %v1883_v54 }
 0x1cd   :  { %v804_v6 = vpop.f32.mrf.mxu0 }
 0x1ce   :  { %v904_v3 = vpack.c.bf16 %v874_v50, %v872_v2  ;;  %v805_v8 = vadd.f32 %v804_v6, %v1879_v57  ;;  %v875_v17 = vmax.f32 %v803_v10, 0.0 }
 0x1cf   :  { %v806_v7 = vpop.f32.mrf.mxu0 }
 0x1d0   :  { %v807_v9 = vadd.f32 %v806_v7, %v1883_v54  ;;  %1086 = vmatprep.mubr.bf16.mxu1 %v904_v3  ;;  %v876_v15 = vmax.f32 %v805_v8, 0.0 }
 0x1d1   :  { %v808_v11 = vpop.f32.mrf.mxu0  ;;  %1087 = vmatmul.mubr.bf16.vlgmr.msra.gmra.mxu1 %v903_v51 }
 0x1d2   :  { %v809_v12 = vadd.f32 %v808_v11, %v1879_v57  ;;  %v877_v13 = vmax.f32 %v807_v9, 0.0 }
 0x1d3   :  { %v812_v14 = vpop.f32.mrf.mxu0 }
 0x1d4   :  { %v878_v16 = vmax.f32 %v809_v12, 0.0  ;;  %v905_v20 = vpack.c.bf16 %v877_v13, %v875_v17  ;;  %v813_v24 = vadd.f32 %v812_v14, %v1883_v54 }
 0x1d5   :  { %v814_v18 = vpop.f32.mrf.mxu0 }
 0x1d6   :  { %v906_v19 = vpack.c.bf16 %v878_v16, %v876_v15  ;;  %v815_v22 = vadd.f32 %v814_v18, %v1879_v57  ;;  %v879_v30 = vmax.f32 %v813_v24, 0.0 }
 0x1d7   :  { %v816_v21 = vpop.f32.mrf.mxu0 }
 0x1d8   :  { %v817_v23 = vadd.f32 %v816_v21, %v1883_v54  ;;  %1094 = vmatprep.mubr.bf16.mxu1 %v906_v19  ;;  %v880_v29 = vmax.f32 %v815_v22, 0.0 }
 0x1d9   :  { %v818_v25 = vpop.f32.mrf.mxu0  ;;  %1095 = vmatmul.mubr.bf16.gmra.mxu1 %v905_v20 }
 0x1da   :  { %v819_v26 = vadd.f32 %v818_v25, %v1879_v57  ;;  %v881_v27 = vmax.f32 %v817_v23, 0.0 }
 0x1db   :  { %v822_v28 = vpop.f32.mrf.mxu0 }
 0x1dc   :  { %v882_v4 = vmax.f32 %v819_v26, 0.0  ;;  %v907_v33 = vpack.c.bf16 %v881_v27, %v879_v30  ;;  %v823_v37 = vadd.f32 %v822_v28, %v1883_v54 }
 0x1dd   :  { %v824_v31 = vpop.f32.mrf.mxu0 }
 0x1de   :  { %v908_v32 = vpack.c.bf16 %v882_v4, %v880_v29  ;;  %v825_v35 = vadd.f32 %v824_v31, %v1879_v57  ;;  %v883_v44 = vmax.f32 %v823_v37, 0.0 }
 0x1df   :  { %v826_v34 = vpop.f32.mrf.mxu0 }
 0x1e0   :  { %v827_v36 = vadd.f32 %v826_v34, %v1883_v54  ;;  %1102 = vmatprep.mubr.bf16.mxu1 %v908_v32  ;;  %v884_v42 = vmax.f32 %v825_v35, 0.0 }
 0x1e1   :  { %v828_v38 = vpop.f32.mrf.mxu0  ;;  %1103 = vmatmul.mubr.bf16.gmra.mxu1 %v907_v33 }
 0x1e2   :  { %v829_v39 = vadd.f32 %v828_v38, %v1879_v57  ;;  %v885_v40 = vmax.f32 %v827_v36, 0.0 }
 0x1e3   :  { %v832_v41 = vpop.f32.mrf.mxu0 }
 0x1e4   :  { %v886_v43 = vmax.f32 %v829_v39, 0.0  ;;  %v909_v47 = vpack.c.bf16 %v885_v40, %v883_v44  ;;  %v833_v53 = vadd.f32 %v832_v41, %v1883_v54  ;;  %v1621_v40 = vmov 0.0  }
 0x1e5   :  { %v834_v45 = vpop.f32.mrf.mxu0  ;;  %1410 = vmatprep.subr.mxu0 %v1621_v40  ;;  %1442 = vmatprep.mubr.msk.f32.mxu0 %vm1622_vm4, %v1621_v40 }
 0x1e6   :  { %v910_v46 = vpack.c.bf16 %v886_v43, %v884_v42  ;;  %v835_v49 = vadd.f32 %v834_v45, %v1879_v57  ;;  %v887_v62 = vmax.f32 %v833_v53, 0.0 }
 0x1e7   :  { %v836_v48 = vpop.f32.mrf.mxu0 }
 0x1e8   :  { %v837_v52 = vadd.f32 %v836_v48, %v1883_v54  ;;  %1110 = vmatprep.mubr.bf16.mxu1 %v910_v46  ;;  %v888_v60 = vmax.f32 %v835_v49, 0.0 }
 0x1e9   :  { %v838_v59 = vpop.f32.mrf.mxu0  ;;  %1111 = vmatmul.mubr.bf16.gmra.mxu1 %v909_v47 }
 0x1ea   :  { %v839_v55 = vadd.f32 %v838_v59, %v1879_v57  ;;  %v889_v56 = vmax.f32 %v837_v52, 0.0 }
 0x1eb   :  { %v842_v58 = vpop.f32.mrf.mxu0 }
 0x1ec   :  { %v890_v61 = vmax.f32 %v839_v55, 0.0  ;;  %v911_v1 = vpack.c.bf16 %v889_v56, %v887_v62  ;;  %v843_v6 = vadd.f32 %v842_v58, %v1883_v54 }
 0x1ed   :  { %v844_v63 = vpop.f32.mrf.mxu0 }
 0x1ee   :  { %v912_v0 = vpack.c.bf16 %v890_v61, %v888_v60  ;;  %v845_v50 = vadd.f32 %v844_v63, %v1879_v57  ;;  %v891_v11 = vmax.f32 %v843_v6, 0.0 }
 0x1ef   :  { %v846_v2 = vpop.f32.mrf.mxu0 }
 0x1f0   :  { %v847_v5 = vadd.f32 %v846_v2, %v1883_v54  ;;  %1118 = vmatprep.mubr.bf16.mxu1 %v912_v0  ;;  %v892_v9 = vmax.f32 %v845_v50, 0.0 }
 0x1f1   :  { %v848_v3 = vpop.f32.mrf.mxu0  ;;  %1119 = vmatmul.mubr.bf16.gmra.mxu1 %v911_v1 }
 0x1f2   :  { %v849_v51 = vadd.f32 %v848_v3, %v1879_v57  ;;  %v893_v7 = vmax.f32 %v847_v5, 0.0 }
 0x1f3   :  { %v852_v8 = vpop.f32.mrf.mxu0 }
 0x1f4   :  { %v894_v10 = vmax.f32 %v849_v51, 0.0  ;;  %v913_v14 = vpack.c.bf16 %v893_v7, %v891_v11  ;;  %v853_v18 = vadd.f32 %v852_v8, %v1883_v54 }
 0x1f5   :  { %v854_v12 = vpop.f32.mrf.mxu0 }
 0x1f6   :  { %v914_v13 = vpack.c.bf16 %v894_v10, %v892_v9  ;;  %v855_v16 = vadd.f32 %v854_v12, %v1879_v57  ;;  %v895_v25 = vmax.f32 %v853_v18, 0.0 }
 0x1f7   :  { %v856_v15 = vpop.f32.mrf.mxu0 }
 0x1f8   :  { %v857_v17 = vadd.f32 %v856_v15, %v1883_v54  ;;  %1126 = vmatprep.mubr.bf16.mxu1 %v914_v13  ;;  %v896_v23 = vmax.f32 %v855_v16, 0.0 }
 0x1f9   :  { %v858_v19 = vpop.f32.mrf.mxu0  ;;  %1127 = vmatmul.mubr.bf16.gmra.mxu1 %v913_v14 }
 0x1fa   :  { %v859_v20 = vadd.f32 %v858_v19, %v1879_v57  ;;  %v897_v21 = vmax.f32 %v857_v17, 0.0 }
 0x1fb   :  { %v862_v22 = vpop.f32.mrf.mxu0 }
 0x1fc   :  { %v898_v24 = vmax.f32 %v859_v20, 0.0  ;;  %v915_v28 = vpack.c.bf16 %v897_v21, %v895_v25  ;;  %v863_v31 = vadd.f32 %v862_v22, %v1883_v54  ;;  %v1934_v20 = vld [vmem:[%s1990_s8] ss:$0 sm:$0xff] }
 0x1fd   :  { %v864_v26 = vpop.f32.mrf.mxu0 }
 0x1fe   :  { %v916_v27 = vpack.c.bf16 %v898_v24, %v896_v23  ;;  %v865_v4 = vadd.f32 %v864_v26, %v1879_v57  ;;  %v899_v37 = vmax.f32 %v863_v31, 0.0 }
 0x1ff   :  { %v866_v29 = vpop.f32.mrf.mxu0 }
 0x200   :  { %v867_v30 = vadd.f32 %v866_v29, %v1883_v54  ;;  %1134 = vmatprep.mubr.bf16.mxu1 %v916_v27  ;;  %v900_v35 = vmax.f32 %v865_v4, 0.0 }
 0x201   :  { %v868_v32 = vpop.f32.mrf.mxu0  ;;  %1135 = vmatmul.mubr.bf16.gmra.mxu1 %v915_v28 }
 0x202   :  { %v869_v33 = vadd.f32 %v868_v32, %v1879_v57  ;;  %v901_v34 = vmax.f32 %v867_v30, 0.0 }
 0x204   :  { %v902_v36 = vmax.f32 %v869_v33, 0.0  ;;  %v917_v39 = vpack.c.bf16 %v901_v34, %v899_v37 }
 0x206   :  { %v918_v38 = vpack.c.bf16 %v902_v36, %v900_v35 }
 0x208   :  { %1142 = vmatprep.mubr.bf16.mxu1 %v918_v38 }
 0x209   :  { %1143 = vmatmul.mubr.bf16.gmra.mxu1 %v917_v39 }
 0x291   :  { %v1345_v41 = vpop.f32.mrf.mxu1 }
 0x293   :  { %v1346_v42 = vpop.f32.mrf.mxu1 }
 0x294   :  { %v1919_v54 = vadd.f32 %v1346_v42, %v1345_v41 }
 0x295   :  { %v1348_v43 = vpop.f32.mrf.mxu1 }
 0x297   :  { %v1349_v57 = vpop.f32.mrf.mxu1 }
 0x298   :  { %v1921_v44 = vadd.f32 %v1349_v57, %v1348_v43 }
 0x299   :  { %v1351_v45 = vpop.f32.mrf.mxu1 }
 0x29b   :  { %v1352_v46 = vpop.f32.mrf.mxu1 }
 0x29c   :  { %v1923_v47 = vadd.f32 %v1352_v46, %v1351_v45 }
 0x29d   :  { %v1354_v48 = vpop.f32.mrf.mxu1 }
 0x29f   :  { %v1355_v49 = vpop.f32.mrf.mxu1 }
 0x2a0   :  { %v1925_v52 = vadd.f32 %v1355_v49, %v1354_v48 }
 0x2a1   :  { %v1357_v53 = vpop.f32.mrf.mxu1 }
 0x2a3   :  { %v1358_v59 = vpop.f32.mrf.mxu1 }
 0x2a4   :  { %v1927_v55 = vadd.f32 %v1358_v59, %v1357_v53  ;;  %v1100_v59 = vadd.f32 %v1925_v52, %v1934_v20  ;;  %v1089_v52 = vadd.f32 %v1919_v54, %v1934_v20 }
 0x2a5   :  { %v1360_v56 = vpop.f32.mrf.mxu1 }
 0x2a6   :  { %v1105_v49 = vadd.f32 %v1927_v55, %v1934_v20  ;;  %v1092_v55 = vadd.f32 %v1921_v44, %v1934_v20  ;;  %v1169_v44 = vstv %s1992_s10 }
 0x2a7   :  { %v1361_v58 = vpop.f32.mrf.mxu1 }
 0x2a8   :  { %v1929_v60 = vadd.f32 %v1361_v58, %v1360_v56  ;;  %v1155_v56 = vmax.f32 %v1105_v49, 0.0  ;;  %v1097_v58 = vadd.f32 %v1923_v47, %v1934_v20  ;;  %v1167_v47 = vld [vmem:[%s1991_s9] sm:$0x1] }
 0x2a9   :  { %v1363_v61 = vpop.f32.mrf.mxu1 }
 0x2aa   :  { %v1108_v46 = vadd.f32 %v1929_v60, %v1934_v20  ;;  %v1154_v60 = vmax.f32 %v1100_v59, 0.0 }
 0x2ab   :  { %v1364_v62 = vpop.f32.mrf.mxu1 }
 0x2ac   :  { %v1365_v63 = vadd.f32 %v1364_v62, %v1363_v61  ;;  %v1156_v53 = vmax.f32 %v1108_v46, 0.0  ;;  %v1153_v61 = vmax.f32 %v1097_v58, 0.0  ;;  %v1152_v62 = vmax.f32 %v1092_v55, 0.0 }
 0x2ad   :  { %v1366_v0 = vpop.f32.mrf.mxu1 }
 0x2ae   :  { %v1113_v57 = vadd.f32 %v1365_v63, %v1934_v20  ;;  %v1151_v63 = vmax.f32 %v1089_v52, 0.0 }
 0x2af   :  { %v1367_v1 = vpop.f32.mrf.mxu1 }
 0x2b0   :  { %v1368_v2 = vadd.f32 %v1367_v1, %v1366_v0  ;;  %v1157_v48 = vmax.f32 %v1113_v57, 0.0 }
 0x2b1   :  { %v1369_v50 = vpop.f32.mrf.mxu1 }
 0x2b2   :  { %v1116_v42 = vadd.f32 %v1368_v2, %v1934_v20 }
 0x2b3   :  { %v1370_v5 = vpop.f32.mrf.mxu1 }
 0x2b4   :  { %v1371_v36 = vadd.f32 %v1370_v5, %v1369_v50  ;;  %v1158_v45 = vmax.f32 %v1116_v42, 0.0 }
 0x2b5   :  { %v1372_v6 = vpop.f32.mrf.mxu1 }
 0x2b6   :  { %v1121_v39 = vadd.f32 %v1371_v36, %v1934_v20 }
 0x2b7   :  { %v1373_v3 = vpop.f32.mrf.mxu1 }
 0x2b8   :  { %v1374_v33 = vadd.f32 %v1373_v3, %v1372_v6  ;;  %v1159_v43 = vmax.f32 %v1121_v39, 0.0 }
 0x2b9   :  { %v1375_v51 = vpop.f32.mrf.mxu1 }
 0x2ba   :  { %v1124_v37 = vadd.f32 %v1374_v33, %v1934_v20 }
 0x2bb   :  { %v1376_v7 = vpop.f32.mrf.mxu1 }
 0x2bc   :  { %v1377_v30 = vadd.f32 %v1376_v7, %v1375_v51  ;;  %v1160_v41 = vmax.f32 %v1124_v37, 0.0 }
 0x2bd   :  { %v1378_v8 = vpop.f32.mrf.mxu1 }
 0x2be   :  { %v1129_v34 = vadd.f32 %v1377_v30, %v1934_v20 }
 0x2bf   :  { %v1379_v9 = vpop.f32.mrf.mxu1 }
 0x2c0   :  { %v1380_v28 = vadd.f32 %v1379_v9, %v1378_v8  ;;  %v1161_v38 = vmax.f32 %v1129_v34, 0.0 }
 0x2c1   :  { %v1381_v10 = vpop.f32.mrf.mxu1 }
 0x2c2   :  { %v1132_v31 = vadd.f32 %v1380_v28, %v1934_v20 }
 0x2c3   :  { %v1382_v11 = vpop.f32.mrf.mxu1 }
 0x2c4   :  { %v1383_v25 = vadd.f32 %v1382_v11, %v1381_v10  ;;  %v1162_v35 = vmax.f32 %v1132_v31, 0.0 }
 0x2c5   :  { %v1384_v12 = vpop.f32.mrf.mxu1 }
 0x2c6   :  { %v1137_v29 = vadd.f32 %v1383_v25, %v1934_v20 }
 0x2c7   :  { %v1385_v13 = vpop.f32.mrf.mxu1 }
 0x2c8   :  { %v1386_v22 = vadd.f32 %v1385_v13, %v1384_v12  ;;  %v1163_v32 = vmax.f32 %v1137_v29, 0.0 }
 0x2c9   :  { %v1387_v14 = vpop.f32.mrf.mxu1 }
 0x2ca   :  { %v1140_v26 = vadd.f32 %v1386_v22, %v1934_v20 }
 0x2cb   :  { %v1388_v15 = vpop.f32.mrf.mxu1 }
 0x2cc   :  { %v1389_v18 = vadd.f32 %v1388_v15, %v1387_v14  ;;  %v1164_v4 = vmax.f32 %v1140_v26, 0.0 }
 0x2cd   :  { %v1390_v16 = vpop.f32.mrf.mxu1 }
 0x2ce   :  { %v1145_v23 = vadd.f32 %v1389_v18, %v1934_v20 }
 0x2cf   :  { %v1391_v17 = vpop.f32.mrf.mxu1 }
 0x2d0   :  { %v1392_v19 = vadd.f32 %v1391_v17, %v1390_v16  ;;  %v1165_v27 = vmax.f32 %v1145_v23, 0.0 }
 0x2d2   :  { %v1148_v21 = vadd.f32 %v1392_v19, %v1934_v20 }
 0x2d4   :  { %v1166_v24 = vmax.f32 %v1148_v21, 0.0 }
 0x2d6   :  { %1411 = vmatpush3.xpose.msra.mxu0 %v1166_v24 }
 0x2d7   :  { %1412 = vmatprep.subr.mxu0 %v1621_v40 }
 0x2da   :  { %1413 = vmatpush3.xpose.msra.mxu0 %v1165_v27 }
 0x2db   :  { %1414 = vmatprep.subr.mxu0 %v1621_v40 }
 0x2de   :  { %1415 = vmatpush3.xpose.msra.mxu0 %v1164_v4 }
 0x2df   :  { %1416 = vmatprep.subr.mxu0 %v1621_v40 }
 0x2e2   :  { %1417 = vmatpush3.xpose.msra.mxu0 %v1163_v32 }
 0x2e3   :  { %1418 = vmatprep.subr.mxu0 %v1621_v40 }
 0x2e6   :  { %1419 = vmatpush3.xpose.msra.mxu0 %v1162_v35 }
 0x2e7   :  { %1420 = vmatprep.subr.mxu0 %v1621_v40 }
 0x2ea   :  { %1421 = vmatpush3.xpose.msra.mxu0 %v1161_v38 }
 0x2eb   :  { %1422 = vmatprep.subr.mxu0 %v1621_v40 }
 0x2ee   :  { %1423 = vmatpush3.xpose.msra.mxu0 %v1160_v41 }
 0x2ef   :  { %1424 = vmatprep.subr.mxu0 %v1621_v40 }
 0x2f2   :  { %1425 = vmatpush3.xpose.msra.mxu0 %v1159_v43 }
 0x2f3   :  { %1426 = vmatprep.subr.mxu0 %v1621_v40 }
 0x2f6   :  { %1427 = vmatpush3.xpose.msra.mxu0 %v1158_v45 }
 0x2f7   :  { %1428 = vmatprep.subr.mxu0 %v1621_v40 }
 0x2fa   :  { %1429 = vmatpush3.xpose.msra.mxu0 %v1157_v48 }
 0x2fb   :  { %1430 = vmatprep.subr.mxu0 %v1621_v40 }
 0x2fe   :  { %1431 = vmatpush3.xpose.msra.mxu0 %v1156_v53 }
 0x2ff   :  { %1432 = vmatprep.subr.mxu0 %v1621_v40 }
 0x302   :  { %1433 = vmatpush3.xpose.msra.mxu0 %v1155_v56 }
 0x303   :  { %1434 = vmatprep.subr.mxu0 %v1621_v40 }
 0x306   :  { %1435 = vmatpush3.xpose.msra.mxu0 %v1154_v60 }
 0x307   :  { %1436 = vmatprep.subr.mxu0 %v1621_v40 }
 0x30a   :  { %1437 = vmatpush3.xpose.msra.mxu0 %v1153_v61 }
 0x30b   :  { %1438 = vmatprep.subr.mxu0 %v1621_v40 }
 0x30e   :  { %1439 = vmatpush3.xpose.msra.mxu0 %v1152_v62 }
 0x30f   :  { %1440 = vmatprep.subr.mxu0 %v1621_v40 }
 0x312   :  { %1441 = vmatpush3.xpose.msra.mxu0 %v1151_v63 }
 0x315   :  { %1443 = vmatmul.mubr.f32.vlgmr.msra.gmra.mxu0 %v1167_v47 }
 0x3d5   :  { %v1236_v0 = vpop.f32.mrf.mxu0 }
 0x3d6   :  { %v1237_v1 = vadd.f32 %v1236_v0, %v1169_v44 }
 0x3d7   :  { %v1444_v54 = vpop.f32.mrf.mxu0 }
 0x3d8   :  { %1240 = vst [vmem:[#allocation9] sm:$0x1] %v1237_v1 }
 0x3d9   :  { %1597 = shalt.err (!%p1594_p5)
}
 0x3da   :  { %1250 = dma.vmem_to_hbm [thread:$0]  %s1248_s17, 16, %s1993_s11, [#allocation5]  }
 0x3db   :  { %1610 = dma.done.wait [#allocation5], 16  }
 0x3dc   :  { %1611 = vsyncadd [#allocation5], 4294967280 }
 0x3dd   :  { %1254 = vsyncpa [#allocation4], 1 }
 0x3de   :  { %1255 = vsyncpa [#allocation7], 1 }
 0x3df   :  { %1256 = vsyncpa [#allocation5], 1 }

</bundles_post_ra>
